<compile_context>
chip_gen: v7x
topology: tpu7x:2x2x1
jax: 0.10.0
libtpu: 0.0.40
codegen_flags: <defaults>
</compile_context>

<pallas_src>
import functools

import jax
import jax.numpy as jnp
from jax.experimental import pallas as pl
from jax.experimental.pallas import tpu as pltpu


# ----------------------------------------------------------------------------
# Host-side glue: interpolation matrices (bilinear, align_corners=True)
# ----------------------------------------------------------------------------
def _interp_matrix(out_size: int, in_size: int) -> jnp.ndarray:
    """Row-stochastic (out_size, in_size) matrix for 1-D bilinear, align_corners=True."""
    if out_size == 1 or in_size == 1:
        src = jnp.zeros((out_size,), dtype=jnp.float32)
    else:
        src = jnp.arange(out_size, dtype=jnp.float32) * (in_size - 1) / (out_size - 1)
    i0 = jnp.clip(jnp.floor(src).astype(jnp.int32), 0, in_size - 1)
    i1 = jnp.clip(i0 + 1, 0, in_size - 1)
    frac = src - i0.astype(jnp.float32)
    w = ((1.0 - frac)[:, None] * jax.nn.one_hot(i0, in_size, dtype=jnp.float32)
         + frac[:, None] * jax.nn.one_hot(i1, in_size, dtype=jnp.float32))
    return w  # (out_size, in_size)


# ----------------------------------------------------------------------------
# Kernel bodies
# ----------------------------------------------------------------------------
def _conv_gn_relu_compute(cols_ref, w_ref, amean_ref, g_ref, b_ref, eps):
    """Shared conv3x3 + GroupNorm + ReLU compute; returns (C_out, H*W) f32."""
    cols = cols_ref[0]                                                   # (9*C_in, H*W)
    # 3x3 conv as one MXU matmul over the im2col columns.
    y = jnp.dot(w_ref[...], cols, preferred_element_type=jnp.float32)   # (C_out, H*W)

    # GroupNorm statistics: per-channel sums over lanes, then group-aggregate via
    # a small matmul with the precomputed group-averaging matrix (already scaled
    # by 1 / (channels_per_group * H * W)).
    s = jnp.sum(y, axis=1, keepdims=True)                                # (C_out, 1)
    ss = jnp.sum(y * y, axis=1, keepdims=True)                           # (C_out, 1)
    mu = jnp.dot(amean_ref[...], s, preferred_element_type=jnp.float32)  # E[x]   per group
    ex2 = jnp.dot(amean_ref[...], ss, preferred_element_type=jnp.float32)  # E[x^2] per group
    var = ex2 - mu * mu                                                  # biased variance
    inv = jax.lax.rsqrt(var + eps)                                       # EUP rsqrt
    scale = g_ref[...] * inv                                             # (C_out, 1)
    shift = b_ref[...] - mu * scale                                      # (C_out, 1)

    # Normalize + affine + ReLU (lane-broadcast of the per-channel columns).
    return jnp.maximum(y * scale + shift, 0.0)                           # (C_out, H*W)


def _conv_gn_relu_kernel(cols_ref, w_ref, amean_ref, g_ref, b_ref, o_ref, *, eps):
    z = _conv_gn_relu_compute(cols_ref, w_ref, amean_ref, g_ref, b_ref, eps)
    o_ref[0] = z.astype(o_ref.dtype)


def _conv_gn_relu_up_kernel(cols_ref, w_ref, amean_ref, g_ref, b_ref, kt_ref, o_ref, *, eps):
    z = _conv_gn_relu_compute(cols_ref, w_ref, amean_ref, g_ref, b_ref, eps)
    # Bilinear x2 upsample (align_corners=True) as a single pre-transposed matmul:
    # out (C_out, H2*W2) = z (C_out, H*W) @ kron(Wh, Ww)^T (H*W, H2*W2).
    out = jnp.dot(z, kt_ref[...], preferred_element_type=jnp.float32)
    o_ref[0] = out.astype(o_ref.dtype)


# ----------------------------------------------------------------------------
# Wrapper
# ----------------------------------------------------------------------------
def conv3x3_gn_relu_forward(x, weight, gamma, beta, *, upsample=False,
                            groups=32, eps=1e-5):
    """Equivalent of Conv3x3GNReLU(in_ch, out_ch, upsample).forward(x).

    x:      (N, C_in, H, W)   NCHW, like PyTorch
    weight: (C_out, C_in, 3, 3)  conv weight (no bias)
    gamma:  (C_out,)  GroupNorm weight
    beta:   (C_out,)  GroupNorm bias
    """
    n, c_in, h, w = x.shape
    c_out = weight.shape[0]
    assert weight.shape == (c_out, c_in, 3, 3), weight.shape
    assert c_out % groups == 0, "GroupNorm(32, C_out) requires C_out % 32 == 0"
    cpg = c_out // groups
    hw = h * w

    xf = x.astype(jnp.float32)

    # --- layout plumbing (plain JAX): channels-first im2col, (N, 9*C_in, H*W) ---
    xp = jnp.pad(xf, ((0, 0), (0, 0), (1, 1), (1, 1)))
    patches = jnp.stack(
        [xp[:, :, dy:dy + h, dx:dx + w] for dy in range(3) for dx in range(3)],
        axis=2)                                           # (N, C_in, 9, H, W)
    cols = patches.reshape(n, c_in * 9, hw)               # tap order matches weight reshape

    wmat = weight.astype(jnp.float32).reshape(c_out, c_in * 9)   # (C_out, 9*C_in)

    # Group-averaging matrix: (A @ per_channel_sums)[c] = mean over c's group.
    gid = jnp.arange(c_out) // cpg
    a_mean = (gid[:, None] == gid[None, :]).astype(jnp.float32) / float(cpg * hw)

    g2 = gamma.astype(jnp.float32).reshape(c_out, 1)
    b2 = beta.astype(jnp.float32).reshape(c_out, 1)

    conv_flops = 2 * n * hw * (9 * c_in) * c_out
    bytes_in = cols.size * 4 + wmat.size * 4 + a_mean.size * 4

    if upsample:
        h_out, w_out = 2 * h, 2 * w
        hw_out = h_out * w_out
        wh = _interp_matrix(h_out, h)                      # (H2, H)
        ww = _interp_matrix(w_out, w)                      # (W2, W)
        kt = jnp.kron(wh, ww).T                            # (H*W, H2*W2), pre-transposed
        kernel = functools.partial(_conv_gn_relu_up_kernel, eps=float(eps))
        operands = (cols, wmat, a_mean, g2, b2, kt)
        in_specs = [
            pl.BlockSpec((1, c_in * 9, hw), lambda b: (b, 0, 0)),
            pl.BlockSpec((c_out, c_in * 9), lambda b: (0, 0)),
            pl.BlockSpec((c_out, c_out), lambda b: (0, 0)),
            pl.BlockSpec((c_out, 1), lambda b: (0, 0)),
            pl.BlockSpec((c_out, 1), lambda b: (0, 0)),
            pl.BlockSpec((hw, hw_out), lambda b: (0, 0)),
        ]
        flops = conv_flops + 2 * n * c_out * hw * hw_out
        bytes_accessed = bytes_in + kt.size * 4 + n * c_out * hw_out * 4
    else:
        h_out, w_out = h, w
        hw_out = hw
        kernel = functools.partial(_conv_gn_relu_kernel, eps=float(eps))
        operands = (cols, wmat, a_mean, g2, b2)
        in_specs = [
            pl.BlockSpec((1, c_in * 9, hw), lambda b: (b, 0, 0)),
            pl.BlockSpec((c_out, c_in * 9), lambda b: (0, 0)),
            pl.BlockSpec((c_out, c_out), lambda b: (0, 0)),
            pl.BlockSpec((c_out, 1), lambda b: (0, 0)),
            pl.BlockSpec((c_out, 1), lambda b: (0, 0)),
        ]
        flops = conv_flops
        bytes_accessed = bytes_in + n * c_out * hw_out * 4

    out = pl.pallas_call(
        kernel,
        out_shape=jax.ShapeDtypeStruct((n, c_out, hw_out), jnp.float32),
        grid_spec=pltpu.PrefetchScalarGridSpec(
            num_scalar_prefetch=0,
            grid=(n,),
            in_specs=in_specs,
            out_specs=pl.BlockSpec((1, c_out, hw_out), lambda b: (b, 0, 0)),
        ),
        compiler_params=pltpu.CompilerParams(
            dimension_semantics=("parallel",),   # lets v7x shard the batch over its 2 TCs
            vmem_limit_bytes=32 * 1024 * 1024,
        ),
        cost_estimate=pl.CostEstimate(
            flops=int(flops),
            transcendentals=int(n * c_out),
            bytes_accessed=int(bytes_accessed),
        ),
    )(*operands)

    # Output is already NCHW-ordered (C_out rows, row-major H*W lanes): just reshape.
    return out.reshape(n, c_out, h_out, w_out).astype(x.dtype)


# ----------------------------------------------------------------------------
# Pure-JAX reference (conv via lax, GN/ReLU/bilinear explicitly)
# ----------------------------------------------------------------------------
def _reference(x, weight, gamma, beta, *, upsample, groups=32, eps=1e-5):
    y = jax.lax.conv_general_dilated(
        x.astype(jnp.float32), weight.astype(jnp.float32),
        window_strides=(1, 1), padding=((1, 1), (1, 1)),
        dimension_numbers=("NCHW", "OIHW", "NCHW"))
    n, c, h, w = y.shape
    yg = y.reshape(n, groups, c // groups, h, w)
    mu = yg.mean(axis=(2, 3, 4), keepdims=True)
    var = ((yg - mu) ** 2).mean(axis=(2, 3, 4), keepdims=True)
    yn = ((yg - mu) / jnp.sqrt(var + eps)).reshape(n, c, h, w)
    z = jnp.maximum(yn * gamma[None, :, None, None] + beta[None, :, None, None], 0.0)
    if upsample:
        wh = _interp_matrix(2 * h, h)
        ww = _interp_matrix(2 * w, w)
        z = jnp.einsum("oh,nchw,pw->ncop", wh, z, ww)
    return z.astype(x.dtype)


if __name__ == "__main__":
    key = jax.random.PRNGKey(0)
    k1, k2, k3, k4 = jax.random.split(key, 4)

    # Conv3x3GNReLU(in_channels=4, out_channels=32) — GroupNorm(32, ...) needs C_out % 32 == 0.
    n, c_in, c_out, h, w = 2, 4, 32, 16, 16
    x = jax.random.normal(k1, (n, c_in, h, w), dtype=jnp.float32)
    weight = 0.2 * jax.random.normal(k2, (c_out, c_in, 3, 3), dtype=jnp.float32)
    gamma = 1.0 + 0.1 * jax.random.normal(k3, (c_out,), dtype=jnp.float32)
    beta = 0.1 * jax.random.normal(k4, (c_out,), dtype=jnp.float32)

    for upsample in (False, True):
        out = conv3x3_gn_relu_forward(x, weight, gamma, beta, upsample=upsample)
        out = jax.block_until_ready(out)
        exp_hw = (2 * h, 2 * w) if upsample else (h, w)
        assert out.shape == (n, c_out) + exp_hw, out.shape

        ref = _reference(x, weight, gamma, beta, upsample=upsample)
        max_err = jnp.max(jnp.abs(out - ref))
        assert jnp.allclose(out, ref, atol=1e-4, rtol=1e-4), (
            f"mismatch (upsample={upsample}), max abs err = {max_err}")

    print("KERNEL_OK")
</pallas_src>

<mosaic_0001>
module attributes {stable_mosaic.version = 11 : i64} {
  func.func @_conv_gn_relu_kernel(%arg0: i32, %arg1: memref<1x36x256xf32, #tpu.memory_space<vmem>>, %arg2: memref<32x36xf32, #tpu.memory_space<vmem>>, %arg3: memref<32x32xf32, #tpu.memory_space<vmem>>, %arg4: memref<32x1xf32, #tpu.memory_space<vmem>>, %arg5: memref<32x1xf32, #tpu.memory_space<vmem>>, %arg6: memref<1x32x256xf32, #tpu.memory_space<vmem>>) attributes {dimension_semantics = [#tpu.dimension_semantics<parallel>], iteration_bounds = array<i64: 2>, scalar_prefetch = 0 : i64, scratch_operands = 0 : i64, tpu.core_type = #tpu.core_type<tc>, window_params = [{transform_indices = @transform_0, window_bounds = array<i64: 1, 36, 256>}, {pipeline_mode = #tpu.pipeline_mode<synchronous>, transform_indices = @transform_1, window_bounds = array<i64: 32, 36>}, {pipeline_mode = #tpu.pipeline_mode<synchronous>, transform_indices = @transform_2, window_bounds = array<i64: 32, 32>}, {pipeline_mode = #tpu.pipeline_mode<synchronous>, transform_indices = @transform_3, window_bounds = array<i64: 32, 1>}, {pipeline_mode = #tpu.pipeline_mode<synchronous>, transform_indices = @transform_4, window_bounds = array<i64: 32, 1>}, {transform_indices = @transform_5, window_bounds = array<i64: 1, 32, 256>}]} {
    %c0 = arith.constant 0 : index
    %c0_0 = arith.constant 0 : index
    %c0_1 = arith.constant 0 : index
    %0 = vector.load %arg1[%c0, %c0_0, %c0_1] : memref<1x36x256xf32, #tpu.memory_space<vmem>>, vector<1x36x256xf32>
    %1 = vector.shape_cast %0 : vector<1x36x256xf32> to vector<36x256xf32>
    %c0_2 = arith.constant 0 : index
    %c0_3 = arith.constant 0 : index
    %2 = vector.load %arg2[%c0_2, %c0_3] : memref<32x36xf32, #tpu.memory_space<vmem>>, vector<32x36xf32>
    %cst = arith.constant dense<0.000000e+00> : vector<32x256xf32>
    %3 = tpu.matmul %2, %1, %cst {dimension_numbers = #tpu.dot_dimension_numbers<[1], [0], [0], [1], [0, 0, 1, 1], [], []>} : vector<32x36xf32>, vector<36x256xf32>, vector<32x256xf32> -> vector<32x256xf32>
    %cst_4 = arith.constant dense<0.000000e+00> : vector<32xf32>
    %4 = vector.multi_reduction <add>, %3, %cst_4 [1] : vector<32x256xf32> to vector<32xf32>
    %5 = vector.shape_cast %4 : vector<32xf32> to vector<32x1xf32>
    %6 = arith.mulf %3, %3 : vector<32x256xf32>
    %cst_5 = arith.constant dense<0.000000e+00> : vector<32xf32>
    %7 = vector.multi_reduction <add>, %6, %cst_5 [1] : vector<32x256xf32> to vector<32xf32>
    %8 = vector.shape_cast %7 : vector<32xf32> to vector<32x1xf32>
    %c0_6 = arith.constant 0 : index
    %c0_7 = arith.constant 0 : index
    %9 = vector.load %arg3[%c0_6, %c0_7] : memref<32x32xf32, #tpu.memory_space<vmem>>, vector<32x32xf32>
    %cst_8 = arith.constant dense<0.000000e+00> : vector<32x1xf32>
    %10 = tpu.matmul %9, %5, %cst_8 {dimension_numbers = #tpu.dot_dimension_numbers<[1], [0], [0], [1], [0, 0, 1, 1], [], []>} : vector<32x32xf32>, vector<32x1xf32>, vector<32x1xf32> -> vector<32x1xf32>
    %c0_9 = arith.constant 0 : index
    %c0_10 = arith.constant 0 : index
    %11 = vector.load %arg3[%c0_9, %c0_10] : memref<32x32xf32, #tpu.memory_space<vmem>>, vector<32x32xf32>
    %cst_11 = arith.constant dense<0.000000e+00> : vector<32x1xf32>
    %12 = tpu.matmul %11, %8, %cst_11 {dimension_numbers = #tpu.dot_dimension_numbers<[1], [0], [0], [1], [0, 0, 1, 1], [], []>} : vector<32x32xf32>, vector<32x1xf32>, vector<32x1xf32> -> vector<32x1xf32>
    %13 = arith.mulf %10, %10 : vector<32x1xf32>
    %14 = arith.subf %12, %13 : vector<32x1xf32>
    %cst_12 = arith.constant 9.99999974E-6 : f32
    %15 = vector.broadcast %cst_12 : f32 to vector<32x1xf32>
    %16 = arith.addf %14, %15 : vector<32x1xf32>
    %17 = math.rsqrt %16 : vector<32x1xf32>
    %c0_13 = arith.constant 0 : index
    %c0_14 = arith.constant 0 : index
    %18 = vector.load %arg4[%c0_13, %c0_14] : memref<32x1xf32, #tpu.memory_space<vmem>>, vector<32x1xf32>
    %19 = arith.mulf %18, %17 : vector<32x1xf32>
    %c0_15 = arith.constant 0 : index
    %c0_16 = arith.constant 0 : index
    %20 = vector.load %arg5[%c0_15, %c0_16] : memref<32x1xf32, #tpu.memory_space<vmem>>, vector<32x1xf32>
    %21 = arith.mulf %10, %19 : vector<32x1xf32>
    %22 = arith.subf %20, %21 : vector<32x1xf32>
    %23 = vector.broadcast %19 : vector<32x1xf32> to vector<32x256xf32>
    %24 = arith.mulf %3, %23 : vector<32x256xf32>
    %25 = vector.broadcast %22 : vector<32x1xf32> to vector<32x256xf32>
    %26 = arith.addf %24, %25 : vector<32x256xf32>
    %cst_17 = arith.constant 0.000000e+00 : f32
    %27 = vector.broadcast %cst_17 : f32 to vector<32x256xf32>
    %28 = arith.maximumf %26, %27 : vector<32x256xf32>
    %c0_18 = arith.constant 0 : index
    %c0_19 = arith.constant 0 : index
    %c0_20 = arith.constant 0 : index
    %29 = vector.load %arg6[%c0_18, %c0_19, %c0_20] : memref<1x32x256xf32, #tpu.memory_space<vmem>>, vector<1x32x256xf32>
    %30 = vector.shape_cast %29 : vector<1x32x256xf32> to vector<32x256xf32>
    %31 = vector.shape_cast %28 : vector<32x256xf32> to vector<1x32x256xf32>
    tpu.vector_store %arg6[%c0_18, %c0_19, %c0_20], %31 {strides = array<i32>} : memref<1x32x256xf32, #tpu.memory_space<vmem>>, vector<1x32x256xf32>,
    return
  }
  func.func @transform_0(%arg0: i32) -> (i32, i32, i32) {
    %c0_i32 = arith.constant 0 : i32
    %c0_i32_0 = arith.constant 0 : i32
    %c0_i32_1 = arith.constant 0 : i32
    return %arg0, %c0_i32, %c0_i32_0 : i32, i32, i32
  }
  func.func @transform_1(%arg0: i32) -> (i32, i32) {
    %c0_i32 = arith.constant 0 : i32
    %c0_i32_0 = arith.constant 0 : i32
    %c0_i32_1 = arith.constant 0 : i32
    return %c0_i32, %c0_i32_0 : i32, i32
  }
  func.func @transform_2(%arg0: i32) -> (i32, i32) {
    %c0_i32 = arith.constant 0 : i32
    %c0_i32_0 = arith.constant 0 : i32
    %c0_i32_1 = arith.constant 0 : i32
    return %c0_i32, %c0_i32_0 : i32, i32
  }
  func.func @transform_3(%arg0: i32) -> (i32, i32) {
    %c0_i32 = arith.constant 0 : i32
    %c0_i32_0 = arith.constant 0 : i32
    %c0_i32_1 = arith.constant 0 : i32
    return %c0_i32, %c0_i32_0 : i32, i32
  }
  func.func @transform_4(%arg0: i32) -> (i32, i32) {
    %c0_i32 = arith.constant 0 : i32
    %c0_i32_0 = arith.constant 0 : i32
    %c0_i32_1 = arith.constant 0 : i32
    return %c0_i32, %c0_i32_0 : i32, i32
  }
  func.func @transform_5(%arg0: i32) -> (i32, i32, i32) {
    %c0_i32 = arith.constant 0 : i32
    %c0_i32_0 = arith.constant 0 : i32
    %c0_i32_1 = arith.constant 0 : i32
    return %arg0, %c0_i32, %c0_i32_0 : i32, i32, i32
  }
}

</mosaic_0001>

<bundles_post_ra>
// kernel: tpu_custom_call.1
= control target key start
LH: loop header
LB: loop body
LE: loop exit
PB: predicated region body
PF: predicated region fallthrough
CT: control target
= control target key end

     0   :  { %10 = vsyncpa [#allocation3], 0  ;;  %s1218_s0 = inlined_call_operand.vmem [shape: f32[2,36,256], index: 0, kind: input, shape index: {}]   ;;  %s1219_s1 = inlined_call_operand.vmem [shape: f32[32,36], index: 1, kind: input, shape index: {}]   ;;  %s1220_s2 = inlined_call_operand.vmem [shape: f32[32,32], index: 2, kind: input, shape index: {}]   ;;  %s1221_s3 = inlined_call_operand.vmem [shape: f32[32,1], index: 3, kind: input, shape index: {}]   ;;  %s1222_s4 = inlined_call_operand.vmem [shape: f32[32,1], index: 4, kind: input, shape index: {}]   ;;  %s1223_s5 = inlined_call_operand.hbm [shape: f32[2,32,256], index: 5, kind: output, shape index: {}]  }
   0x1   :  { %12 = vsyncpa [#allocation3 + $0x1], 0  ;;  %s996_s18 = smov 0   ;;  %s998_s19 = smov 0  }
   0x2   :  { %s1000_s20 = smov 0   ;;  %s1002_s21 = smov 0  }
   0x3 LB: > { %s1017_s22 = sadd.s32 4294967295, %s959_s21   ;;  %s749_s23 = sadd.s32 4294967294, %s959_s21   ;;  %s959_s21 = sphi %s1002_s21, %s1229_s21   ;;  %s955_s20 = sphi %s1000_s20, %s1228_s20   ;;  %s951_s19 = sphi %s998_s19, %s1227_s19   ;;  %s947_s18 = sphi %s996_s18, %s1226_s18  }
   0x4   : > { %s1021_s24 = sadd.s32 1, %s959_s21   ;;  %s135_s25 = sadd.s32 1, %s955_s20 }
   0x5   : > { %s132_s26 = ssub.s32 %s959_s21, %s1021_s24  ;;  %p145_p0 = scmp.ne.s32.totalorder %s955_s20, %s951_s19 }
   0x6   : > { %p133_p1 = scmp.eq.s32.totalorder %s132_s26, 0  ;;  %p146_p2 = scmp.eq.s32.totalorder %s1017_s22, 1 }
   0x7   : > { %p151_p3 = scmp.ne.s32.totalorder %s951_s19, %s947_s18  ;;  %p152_p4 = scmp.eq.s32.totalorder %s749_s23, 1 }
   0x8   : > { %s1032_s27 = scalar_select %p133_p1, %s955_s20, %s135_s25  }
   0x9   : > { %p1034_p5 = por %p146_p2, %p145_p0  ;;  %p1038_p6 = por %p152_p4, %p151_p3 }
   0xa   : > { %p752_p7 = scmp.ge.s32.totalorder %s959_s21, 1  ;;  %p190_p8 = scmp.lt.s32.totalorder %s959_s21, 3 }
   0xc   : > { %p191_p9 = pnand %p752_p7, %p190_p8 }
   0xd   : > { %p218_p10 = scmp.lt.s32.totalorder (!%p191_p9), %s1017_s22, 1  ;;  %v961_v0 = vmov (!%p191_p9), 0.0   ;;  %vm250_vm0 = vcmask (!%p191_p9), 1043456   ;;  %v233_v15 = vld [vmem:[%s1219_s1] sm:$0xff] (!%p191_p9)  ;;  %vm237_vm1 = vcmask (!%p191_p9), 293888   ;;  %v234_v16 = vld [vmem:[%s1219_s1 + $0x8] sm:$0xff] (!%p191_p9) }
   0xe   : > { %194 = sbr.rel (%p191_p9) target bundleno = 822 (0x336), region = 40  ;;  %321 = vmatprep.mubr.f32.mxu0 (!%p191_p9), %v961_v0  ;;  %v235_v17 = vld [vmem:[%s1219_s1 + $0x10] sm:$0xff] (!%p191_p9)  ;;  %v236_v18 = vld [vmem:[%s1219_s1 + $0x18] sm:$0xff] (!%p191_p9)  ;;  %v378_v43 = vld [vmem:[%s1220_s2] sm:$0xff] (!%p191_p9)  ;;  %vm382_vm2 = vcmask (!%p191_p9), 261120   ;;  %v962_v59 = vmov (!%p191_p9), 0  }
   0xf   : > { %799 = vmatprep.mubr.msk.f32.mxu1 (!%p191_p9), %vm382_vm2, %v378_v43  ;;  %v379_v52 = vld [vmem:[%s1220_s2 + $0x8] sm:$0xff] (!%p191_p9)  ;;  %v380_v54 = vld [vmem:[%s1220_s2 + $0x10] sm:$0xff] (!%p191_p9)  ;;  %v381_v57 = vld [vmem:[%s1220_s2 + $0x18] sm:$0xff] (!%p191_p9)  ;;  %888 = vset.pattern.permute.xlu1 (!%p191_p9), %v962_v59  ;;  %s215_s10 = sand.u32 (!%p191_p9), 1, %s951_s19   ;;  %s774_s13 = sshll.u32 (!%p191_p9), %s1017_s22, 10 }
  0x10   : > { %887 = vset.pattern.permute.xlu0 (!%p191_p9), %v962_v59  ;;  %s753_s11 = sshll.u32 (!%p191_p9), %s215_s10, 6  ;;  %s1169_s17 = scalar_lea.hbm (!%p191_p9), %s1223_s5, %s774_s13 }
  0x11   : > { %s1150_s12 = scalar_lea.vmem (!%p191_p9), [#allocation2], %s753_s11  ;;  %s963_s25 = smov (!%p191_p9), [#allocation2]  }
  0x12   : > { %s687_s14 = sshll.u32 (!%p191_p9), %s1150_s12, 4  ;;  %s901_s26 = sshll.u32 (!%p191_p9), %s963_s25, 4  ;;  %s1171_s14 = int_to_ptr.vmem [resolvable:$true] %s687_s14  ;;  %s902_s26 = int_to_ptr.vmem [resolvable:$false] %s901_s26 }
  0x13   : > { %s897_s23 = scalar_lea.vmem (!%p191_p9), %s1171_s14, 1024  ;;  %p904_p0 = scmp.lt.s32.totalorder (!%p191_p9), %s1171_s14, %s902_s26 }
  0x14   : > { %p898_p11 = scmp.ne.s32.totalorder (!%p191_p9), %s1171_s14, %s897_s23 }
  0x15   : > { %s219_s30 = scalar_select %p218_p10, %s1017_s22, 1 }
  0x16   : > { %s1177_s22 = scalar_lea.sflag [#allocation3], %s215_s10  ;;  %p899_p12 = pnand %p898_p11, %p1034_p5 }
  0x17   : > { %s843_s6 = smul.u32 80, %s219_s30  ;;  %s903_s30 = scalar_lea.vmem %s902_s26, 2048 }
  0x18   : > { %p900_p13 = pneg %p899_p12  ;;  %p905_p1 = scmp.lt.s32.totalorder %s903_s30, %s897_s23 }
  0x19   : > { %s222_s9 = scalar_lea.vmem %s1218_s0, %s843_s6 }
  0x1a   : > { %v224_v1 = vld [vmem:[%s222_s9 + $0x8] sm:$0xff]  ;;  %v226_v2 = vld [vmem:[%s222_s9 + $0x18] sm:$0xff]  ;;  %v223_v3 = vld [vmem:[%s222_s9] sm:$0xff]  ;;  %p906_p2 = por %p905_p1, %p904_p0 }
  0x1b   : > { %v819_v4 = vpack.c.bf16 %v226_v2, %v224_v1  ;;  %v225_v5 = vld [vmem:[%s222_s9 + $0x10] sm:$0xff]  ;;  %v228_v6 = vld [vmem:[%s222_s9 + $0x28] sm:$0xff]  ;;  %v230_v7 = vld [vmem:[%s222_s9 + $0x38] sm:$0xff] }
  0x1c   : > { %v821_v8 = vpack.c.bf16 %v225_v5, %v223_v3  ;;  %v823_v9 = vpack.c.bf16 %v230_v7, %v228_v6  ;;  %v227_v10 = vld [vmem:[%s222_s9 + $0x20] sm:$0xff]  ;;  %v229_v11 = vld [vmem:[%s222_s9 + $0x30] sm:$0xff]  ;;  %v232_v13 = vld [vmem:[%s222_s9 + $0x48] sm:$0xf]  ;;  %p907_p3 = pnand %p906_p2, %p900_p13 }
  0x1d   : > { %820 = vmatprep.subr.bf16.mxu0 %v819_v4  ;;  %v825_v12 = vpack.c.bf16 %v229_v11, %v227_v10  ;;  %v231_v14 = vld [vmem:[%s222_s9 + $0x40] sm:$0xf] }
  0x1e   : > { %822 = vmatpush1.bf16.msra.mxu0 %v821_v8 }
  0x1f   : > { %824 = vmatprep.subr.bf16.mxu0 %v823_v9 }
  0x22   : > { %826 = vmatpush1.bf16.msra.mxu0 %v825_v12 }
  0x23   : > { %755 = vmatprep.subr.msk.mxu0 %vm250_vm0, %v232_v13 }
  0x26   : > { %756 = vmatpush1.msk.msra.mxu0 %vm250_vm0, %v231_v14 }
  0x27   : > { %757 = vmatmul.mubr.msk.f32.vlgmr.msra.gmra.mrb[0].mxu0 %vm237_vm1, %v233_v15 }
  0x28   : > { %327 = vmatprep.mubr.f32.mxu0 %v961_v0 }
  0x2b   : > { %758 = vmatmul.mubr.msk.f32.gmra.mrb[2].mxu0 %vm237_vm1, %v234_v16  ;;  %v582_v16 = vld [vmem:[%s1221_s3 + $0x8] sm:$0xff] }
  0x2c   : > { %333 = vmatprep.mubr.f32.mxu0 %v961_v0 }
  0x2f   : > { %759 = vmatmul.mubr.msk.f32.gmra.mrb[4].mxu0 %vm237_vm1, %v235_v17  ;;  %v581_v17 = vld [vmem:[%s1221_s3] sm:$0xff] }
  0x30   : > { %339 = vmatprep.mubr.f32.mxu0 %v961_v0 }
  0x33   : > { %760 = vmatmul.mubr.msk.f32.gmra.mrb[6].mxu0 %vm237_vm1, %v236_v18 }
  0xfa   : > { %v1061_v19 = vpop.f32.mrb[0].mxu0 }
  0xfb   : > { %v1063_v20 = vpop.f32.mrb[1].mxu0  ;;  %v358_v21 = vmul.f32 %v1061_v19, %v1061_v19 }
  0xfc   : > { %v346_v22 = vadd.f32 %v1063_v20, %v1061_v19  ;;  %v359_v23 = vmul.f32 %v1063_v20, %v1063_v20 }
  0xfe   : > { %347 = vadd.xlane.f32.xlu0 %v346_v22  ;;  %v1071_v24 = vpop.f32.mrb[2].mxu0  ;;  %v366_v25 = vadd.f32 %v359_v23, %v358_v21 }
  0xff   : > { %v1073_v26 = vpop.f32.mrb[3].mxu0  ;;  %v360_v27 = vmul.f32 %v1071_v24, %v1071_v24 }
 0x100   : > { %v349_v28 = vadd.f32 %v1073_v26, %v1071_v24  ;;  %v361_v29 = vmul.f32 %v1073_v26, %v1073_v26 }
 0x102   : > { %350 = vadd.xlane.f32.xlu0 %v349_v28  ;;  %v1081_v30 = vpop.f32.mrb[4].mxu0  ;;  %v369_v31 = vadd.f32 %v361_v29, %v360_v27  ;;  %v583_v28 = vld [vmem:[%s1221_s3 + $0x10] sm:$0xff] }
 0x103   : > { %v1083_v32 = vpop.f32.mrb[5].mxu0  ;;  %v362_v33 = vmul.f32 %v1081_v30, %v1081_v30 }
 0x104   : > { %v352_v34 = vadd.f32 %v1083_v32, %v1081_v30  ;;  %v363_v35 = vmul.f32 %v1083_v32, %v1083_v32 }
 0x106   : > { %367 = vadd.xlane.f32.xlu0 %v366_v25  ;;  %353 = vadd.xlane.f32.xlu1 %v352_v34  ;;  %v1091_v36 = vpop.f32.mrb[6].mxu0  ;;  %v372_v37 = vadd.f32 %v363_v35, %v362_v33  ;;  %v584_v25 = vld [vmem:[%s1221_s3 + $0x18] sm:$0xff]  ;;  %v590_v35 = vld [vmem:[%s1222_s4 + $0x8] sm:$0xff] }
 0x107   : > { %v1093_v38 = vpop.f32.mrb[7].mxu0  ;;  %v364_v39 = vmul.f32 %v1091_v36, %v1091_v36 }
 0x108   : > { %v365_v40 = vmul.f32 %v1093_v38, %v1093_v38  ;;  %v355_v41 = vadd.f32 %v1093_v38, %v1091_v36 }
 0x10a   : > { %373 = vadd.xlane.f32.xlu0 %v372_v37  ;;  %356 = vadd.xlane.f32.xlu1 %v355_v41  ;;  %v375_v42 = vadd.f32 %v365_v40, %v364_v39 }
 0x10e   : > { %370 = vadd.xlane.f32.xlu1 %v369_v31 }
 0x112   : > { %376 = vadd.xlane.f32.xlu1 %v375_v42  ;;  %v589_v42 = vld [vmem:[%s1222_s4] sm:$0xff] }
 0x18b   : > { %v348_v44 = vpop.xlane.xlu0 %347 }
 0x18f   : > { %v351_v45 = vpop.xlane.xlu0 %350 }
 0x190   : > { %v827_v46 = vpack.c.bf16 %v351_v45, %v348_v44  ;;  %v591_v44 = vld [vmem:[%s1222_s4 + $0x10] sm:$0xff] }
 0x192   : > { %828 = vmatprep.subr.bf16.mxu1 %v827_v46 }
 0x193   : > { %830 = vmatpush3.bf16.msra.mxu1 %v827_v46  ;;  %v354_v47 = vpop.xlane.xlu1 %353  ;;  %v368_v50 = vpop.xlane.xlu0 %367  ;;  %v592_v46 = vld [vmem:[%s1222_s4 + $0x18] sm:$0xff] }
 0x197   : > { %v357_v48 = vpop.xlane.xlu1 %356  ;;  %v374_v55 = vpop.xlane.xlu0 %373 }
 0x198   : > { %v831_v49 = vpack.c.bf16 %v357_v48, %v354_v47 }
 0x19a   : > { %832 = vmatprep.subr.bf16.mxu1 %v831_v49 }
 0x19b   : > { %834 = vmatpush3.bf16.msra.mxu1 %v831_v49  ;;  %v371_v51 = vpop.xlane.xlu1 %370 }
 0x19c   : > { %v835_v53 = vpack.c.bf16 %v371_v51, %v368_v50 }
 0x19e   : > { %800 = vmatmul.mubr.msk.f32.vlgmr.msra.gmra.mrb[0].mxu1 %vm382_vm2, %v379_v52  ;;  %836 = vmatprep.subr.bf16.mxu1 %v835_v53 }
 0x19f   : > { %838 = vmatpush3.bf16.msra.mxu1 %v835_v53  ;;  %v377_v56 = vpop.xlane.xlu1 %376  ;;  %802 = vmatprep.mubr.msk.f32.mxu1 %vm382_vm2, %v380_v54 }
 0x1a0   : > { %v839_v58 = vpack.c.bf16 %v377_v56, %v374_v55 }
 0x1a2   : > { %803 = vmatmul.mubr.msk.f32.gmra.mrb[2].mxu1 %vm382_vm2, %v381_v57  ;;  %840 = vmatprep.subr.bf16.mxu1 %v839_v58 }
 0x1a3   : > { %842 = vmatpush3.bf16.msra.mxu1 %v839_v58  ;;  %813 = vmatprep.mubr.msk.f32.mxu1 %vm382_vm2, %v378_v43 }
 0x1a6   : > { %814 = vmatmul.mubr.msk.f32.vlgmr.msra.gmra.mrb[4].mxu1 %vm382_vm2, %v379_v52 }
 0x1a7   : > { %816 = vmatprep.mubr.msk.f32.mxu1 %vm382_vm2, %v380_v54 }
 0x1aa   : > { %817 = vmatmul.mubr.msk.f32.gmra.mrb[6].mxu1 %vm382_vm2, %v381_v57 }
 0x271   : > { %v801_v60 = vpop.f32.mrb[0].mxu1 }
 0x272   : > { %v461_v61 = vpop.f32.mrb[1].mxu1  ;;  %v566_v0 = vmul.f32 %v801_v60, %v801_v60 }
 0x273   : > { %v565_v1 = vmul.f32 %v461_v61, %v461_v61 }
 0x275   : > { %v804_v62 = vpop.f32.mrb[2].mxu1 }
 0x276   : > { %v471_v63 = vpop.f32.mrb[3].mxu1  ;;  %v568_v6 = vmul.f32 %v804_v62, %v804_v62 }
 0x277   : > { %v567_v8 = vmul.f32 %v471_v63, %v471_v63 }
 0x279   : > { %v815_v2 = vpop.f32.mrb[4].mxu1 }
 0x27a   : > { %v570_v3 = vsub.f32 %v815_v2, %v566_v0  ;;  %v546_v4 = vpop.f32.mrb[5].mxu1 }
 0x27b   : > { %v569_v5 = vsub.f32 %v546_v4, %v565_v1 }
 0x27c   : > { %v574_v7 = vadd.f32 1e-05, %v570_v3 }
 0x27d   : > { %v573_v9 = vadd.f32 1e-05, %v569_v5  ;;  %v818_v10 = vpop.f32.mrb[6].mxu1 }
 0x27e   : > { %889 = vrsqrt.f32 %v574_v7  ;;  %v572_v11 = vsub.f32 %v818_v10, %v568_v6  ;;  %v556_v12 = vpop.f32.mrb[7].mxu1 }
 0x27f   : > { %891 = vrsqrt.f32 %v573_v9  ;;  %v571_v13 = vsub.f32 %v556_v12, %v567_v8 }
 0x280   : > { %v576_v14 = vadd.f32 1e-05, %v572_v11 }
 0x281   : > { %v575_v15 = vadd.f32 1e-05, %v571_v13 }
 0x282   : > { %893 = vrsqrt.f32 %v576_v14 }
 0x283   : > { %895 = vrsqrt.f32 %v575_v15 }
 0x288   : > { %v890_v18 = vpop.eup %889 }
 0x289   : > { %v892_v21 = vpop.eup %891  ;;  %v586_v22 = vmul.f32 %v890_v18, %v582_v16 }
 0x28a   : > { %v585_v23 = vmul.f32 %v892_v21, %v581_v17 }
 0x28b   : > { %608 = vperm.xlu1 %888, %v586_v22   ;;  %v594_v27 = vmul.f32 %v801_v60, %v586_v22 }
 0x28c   : > { %v894_v29 = vpop.eup %893  ;;  %603 = vperm.xlu0 %887, %v585_v23   ;;  %v593_v31 = vmul.f32 %v585_v23, %v461_v61 }
 0x28d   : > { %v896_v33 = vpop.eup %895  ;;  %v588_v34 = vmul.f32 %v894_v29, %v584_v25  ;;  %v598_v41 = vsub.f32 %v590_v35, %v594_v27 }
 0x28e   : > { %v587_v37 = vmul.f32 %v896_v33, %v583_v28  ;;  %v597_v43 = vsub.f32 %v589_v42, %v593_v31 }
 0x28f   : > { %618 = vperm.xlu1 %888, %v588_v34   ;;  %v596_v39 = vmul.f32 %v804_v62, %v588_v34 }
 0x290   : > { %v595_v40 = vmul.f32 %v587_v37, %v471_v63 }
 0x291   : > { %v600_v47 = vsub.f32 %v592_v46, %v596_v39 }
 0x292   : > { %v599_v45 = vsub.f32 %v591_v44, %v595_v40 }
 0x293   : > { %636 = vperm.xlu1 %888, %v598_v41  }
 0x297   : > { %613 = vperm.xlu1 %888, %v587_v37  }
 0x29b   : > { %631 = vperm.xlu1 %888, %v597_v43  }
 0x29f   : > { %641 = vperm.xlu1 %888, %v599_v45  }
 0x2a3   : > { %646 = vperm.xlu1 %888, %v600_v47  }
 0x30a   : > { %v609_v48 = vpop.permute.xlu1 %608 }
 0x30b   : > { %v623_v50 = vmul.f32 %v609_v48, %v1071_v24  ;;  %v624_v51 = vmul.f32 %v609_v48, %v1073_v26  ;;  %v604_v57 = vpop.permute.xlu0 %603 }
 0x30c   : > { %v621_v24 = vmul.f32 %v604_v57, %v1061_v19  ;;  %v622_v26 = vmul.f32 %v604_v57, %v1063_v20 }
 0x30e   : > { %v619_v49 = vpop.permute.xlu1 %618 }
 0x30f   : > { %v627_v20 = vmul.f32 %v619_v49, %v1091_v36  ;;  %v628_v4 = vmul.f32 %v619_v49, %v1093_v38 }
 0x312   : > { %v637_v52 = vpop.permute.xlu1 %636 }
 0x313   : > { %v651_v53 = vadd.f32 %v637_v52, %v623_v50  ;;  %v652_v54 = vadd.f32 %v637_v52, %v624_v51 }
 0x315   : > { %v659_v55 = vmax.f32 %v651_v53, 0.0  ;;  %v660_v56 = vmax.f32 %v652_v54, 0.0 }
 0x316   : > { %v614_v58 = vpop.permute.xlu1 %613 }
 0x317   : > { %667 = vst [vmem:[%s1150_s12 + $0x10] sm:$0xff] %v659_v55  ;;  %668 = vst [vmem:[%s1150_s12 + $0x18] sm:$0xff] %v660_v56  ;;  %v625_v62 = vmul.f32 %v614_v58, %v1081_v30  ;;  %v626_v63 = vmul.f32 %v614_v58, %v1083_v32 }
 0x31a   : > { %v632_v59 = vpop.permute.xlu1 %631 }
 0x31b   : > { %v649_v60 = vadd.f32 %v632_v59, %v621_v24  ;;  %v650_v61 = vadd.f32 %v632_v59, %v622_v26 }
 0x31d   : > { %v657_v0 = vmax.f32 %v649_v60, 0.0  ;;  %v658_v1 = vmax.f32 %v650_v61, 0.0 }
 0x31e   : > { %v642_v2 = vpop.permute.xlu1 %641 }
 0x31f   : > { %665 = vst [vmem:[%s1150_s12] sm:$0xff] %v657_v0  ;;  %666 = vst [vmem:[%s1150_s12 + $0x8] sm:$0xff] %v658_v1  ;;  %v653_v3 = vadd.f32 %v642_v2, %v625_v62  ;;  %v654_v19 = vadd.f32 %v642_v2, %v626_v63 }
 0x321   : > { %v661_v5 = vmax.f32 %v653_v3, 0.0  ;;  %v662_v30 = vmax.f32 %v654_v19, 0.0 }
 0x322   : > { %v647_v32 = vpop.permute.xlu1 %646 }
 0x323   : > { %669 = vst [vmem:[%s1150_s12 + $0x20] sm:$0xff] %v661_v5  ;;  %670 = vst [vmem:[%s1150_s12 + $0x28] sm:$0xff] %v662_v30  ;;  %v655_v6 = vadd.f32 %v647_v32, %v627_v20  ;;  %v656_v7 = vadd.f32 %v647_v32, %v628_v4 }
 0x325   : > { %v663_v36 = vmax.f32 %v655_v6, 0.0  ;;  %v664_v38 = vmax.f32 %v656_v7, 0.0 }
 0x327   : > { %671 = vst [vmem:[%s1150_s12 + $0x30] sm:$0xff] %v663_v36  ;;  %672 = vst [vmem:[%s1150_s12 + $0x38] sm:$0xff] %v664_v38 }
 0x328   : > { %910 = shalt.err (!%p907_p3)
}
 0x329   : > { %s911_s6 = scalar_lea.hbm %s1169_s17, 1024  ;;  %s915_s9 = scalar_lea.hbm %s1223_s5, 2048 }
 0x32a   : > { %p912_p4 = scmp.ne.s32.totalorder %s1169_s17, %s911_s6  ;;  %p916_p9 = scmp.lt.u32.totalorder %s1169_s17, %s1223_s5 }
 0x32b   : > { %p917_p10 = scmp.lt.u32.totalorder %s915_s9, %s911_s6  ;;  %p919_p12 = scmp.lt.u32.totalorder %s911_s6, %s1169_s17 }
 0x32c   : > { %p913_p7 = pnand %p912_p4, %p1034_p5 }
 0x32d   : > { %p918_p11 = por %p917_p10, %p916_p9 }
 0x32e   : > { %p914_p8 = pneg %p913_p7 }
 0x32f   : > { %p920_p13 = por %p919_p12, %p918_p11 }
 0x331   : > { %p921_p0 = pnand %p920_p13, %p914_p8 }
 0x333   : > { %924 = shalt.err (!%p921_p0)
}
 0x334   : > { %s964_s12 = smov 256   ;;  %s965_s13 = smov 16  }
 0x335   : > { %844 = dma.vmem_to_hbm [thread:$0]  (%p1034_p5), %s1171_s14, 1024, %s1169_s17, %s1177_s22, %s964_s12, %s964_s12, %s965_s13  }
 0x336 PF: > { %p850_p1 = scmp.ge.s32.totalorder %s959_s21, 2  ;;  %s702_s15 = sand.u32 1, %s947_s18  }
 0x337   : > { %s703_s16 = scalar_lea.sflag [#allocation3], %s702_s15 }
 0x338   : > { %p847_p2 = pnand %p850_p1, %p1038_p6 }
 0x33a   : > { %942 = dma.done.wait (!%p847_p2), %s703_s16, 1024  }
 0x33b   : > { %944 = vsyncadd (!%p847_p2), %s703_s16, 4294966272  ;;  %p15_p3 = scmp.ge.s32.totalorder %s1021_s24, 4   ;;  %s1226_s18 = smov %s951_s19 }
 0x33c   : > { %s1227_s19 = smov %s955_s20  ;;  %s1228_s20 = smov %s1032_s27 }
 0x33d   : > { %s1229_s21 = smov %s1021_s24  ;;  %17 = sbr.rel (!%p15_p3) target bundleno = 3 (0x3), region = 75 }
 0x344   :  { %708 = vsyncpa [#allocation3], 1 }
 0x345   :  { %710 = vsyncpa [#allocation3 + $0x1], 1 }

</bundles_post_ra>
